<compile_context>
chip_gen: v7x
topology: tpu7x:2x2x1
jax: 0.10.0
libtpu: 0.0.40
codegen_flags: <defaults>
</compile_context>

<pallas_src>
import jax
import jax.numpy as jnp
from jax.experimental import pallas as pl
from jax.experimental.pallas import tpu as pltpu


def _round_up(x, m):
    return (x + m - 1) // m * m


def _vmem_capacity_bytes():
    # Query physical VMEM; fall back to the most restrictive generation (v7x: 64 MiB per TC).
    try:
        info = pltpu.get_tpu_info()
        cap = getattr(info, "vmem_capacity_bytes", None)
        if cap:
            return int(cap)
    except Exception:
        pass
    return 64 << 20


def _make_generator_kernel(compute_dtype):
    def generator_kernel(z_ref, w1_ref, b1_ref, w23_ref, b23_ref, out_ref):
        # Fused 2-dot MLP on a (b_tile, L) activation tile; weights are VMEM-resident.
        z = z_ref[...].astype(compute_dtype)                                 # cast in-kernel
        h1 = jnp.dot(z, w1_ref[...], preferred_element_type=jnp.float32)     # (b_tile, 64) MXU
        h1 = jnp.maximum(h1 + b1_ref[...], 0.0)                              # ReLU         VPU
        h3 = jnp.dot(h1.astype(compute_dtype), w23_ref[...],
                     preferred_element_type=jnp.float32)                     # (b_tile, Np) MXU
        out_ref[...] = jax.nn.sigmoid(h3 + b23_ref[...]).astype(out_ref.dtype)
    return generator_kernel


def generator_forward(z, w1, b1, w2, b2, w3, b3, *, batch_tile=512,
                      use_bf16_dots=False, out_dtype=jnp.float32):
    """Forward pass of the Generator. Inputs: z (B, L); wi as (in, out); bi as (1, out)."""
    B, L = z.shape
    N = w3.shape[1]

    # ---- algebraic fold of the two back-to-back Linear layers (no nonlinearity between them).
    w23 = jnp.dot(w2, w3, preferred_element_type=jnp.float32)     # (64, N)
    b23 = jnp.dot(b2, w3, preferred_element_type=jnp.float32) + b3  # (1, N)

    # ---- lane-dense output: pad N up to a multiple of 128 (pad cols sliced off at the end).
    N_pad = _round_up(N, 128)
    if N_pad != N:
        w23 = jnp.pad(w23, ((0, 0), (0, N_pad - N)))
        b23 = jnp.pad(b23, ((0, 0), (0, N_pad - N)))

    # ---- dtype selection for the dots (weights pre-cast once; z cast inside the kernel).
    compute_dtype = jnp.bfloat16 if use_bf16_dots else jnp.float32
    if use_bf16_dots:
        w1 = w1.astype(jnp.bfloat16)
        w23 = w23.astype(jnp.bfloat16)
    w_itemsize = jnp.dtype(compute_dtype).itemsize
    out_itemsize = jnp.dtype(out_dtype).itemsize
    z_itemsize = z.dtype.itemsize

    # ---- VMEM budget (v7x: 64 MiB physical; v5e/v6e: 128 MiB).
    vmem_cap = _vmem_capacity_bytes()
    weight_bytes = (L * 64 + 64 * N_pad) * w_itemsize + (64 + N_pad) * 4
    per_row_io = 2 * (L * z_itemsize + N_pad * out_itemsize)       # double-buffered z/out tiles
    per_row_scratch = 4 * (64 + 2 * N_pad)                         # h1 + h3 + sigmoid temp (f32)
    per_row = per_row_io + per_row_scratch
    tile_budget = int(0.5 * vmem_cap)
    max_tile = max(8, ((tile_budget - weight_bytes) // max(per_row, 1)) // 8 * 8)

    # ---- adaptive batch tiling: big tiles to amortize per-step overhead, but keep grid >= 2
    #      when B > 8 so the "parallel" axis can use both v7x TensorCores.
    n_tiles = max(2 if B > 8 else 1, pl.cdiv(B, batch_tile))
    b_tile = _round_up(pl.cdiv(B, n_tiles), 8)
    b_tile = max(8, min(b_tile, max_tile))
    B_pad = _round_up(B, b_tile)
    if B_pad != B:
        z = jnp.pad(z, ((0, B_pad - B), (0, 0)))
    grid = (B_pad // b_tile,)

    # ---- explicit VMEM limit, clamped under physical capacity (headroom for compiler scratch).
    vmem_request = weight_bytes + b_tile * per_row + (2 << 20)
    vmem_limit = int(min(int(0.75 * vmem_cap), max(16 << 20, vmem_request)))

    # ---- advisory cost estimate for the folded two-dot kernel.
    flops = 2 * B_pad * (L * 64 + 64 * N_pad)
    transcendentals = B_pad * N_pad                                 # sigmoid -> exp on the EUP
    bytes_accessed = (B_pad * L * z_itemsize + B_pad * N_pad * out_itemsize
                      + (L * 64 + 64 * N_pad) * w_itemsize + (64 + N_pad) * 4)

    def param_spec(shape):
        return pl.BlockSpec(shape, lambda i: (0, 0))   # resident across all grid steps

    out_pad = pl.pallas_call(
        _make_generator_kernel(compute_dtype),
        out_shape=jax.ShapeDtypeStruct((B_pad, N_pad), out_dtype),
        grid=grid,
        in_specs=[
            pl.BlockSpec((b_tile, L), lambda i: (i, 0)),   # z tile marches over the batch
            param_spec((L, 64)),
            param_spec((1, 64)),
            param_spec((64, N_pad)),
            param_spec((1, N_pad)),
        ],
        out_specs=pl.BlockSpec((b_tile, N_pad), lambda i: (i, 0)),
        compiler_params=pltpu.CompilerParams(
            dimension_semantics=("parallel",),             # megacore sharding on v7x
            vmem_limit_bytes=vmem_limit,
        ),
        cost_estimate=pl.CostEstimate(
            flops=flops,
            transcendentals=transcendentals,
            bytes_accessed=bytes_accessed,
        ),
    )(z, w1, b1, w23, b23)

    # ---- skip the extra HBM pass when no padding occurred.
    if B_pad == B and N_pad == N:
        return out_pad
    return out_pad[:B, :N]


def init_params(key, latent_dim, n_elements):
    # Deterministic synthetic init (uniform, PyTorch-Linear-like fan_in scaling).
    ks = jax.random.split(key, 6)

    def lin(kw, kb, fan_in, fan_out):
        bound = 1.0 / jnp.sqrt(fan_in)
        w = jax.random.uniform(kw, (fan_in, fan_out), jnp.float32, -bound, bound)
        b = jax.random.uniform(kb, (1, fan_out), jnp.float32, -bound, bound)
        return w, b

    w1, b1 = lin(ks[0], ks[1], latent_dim, 64)
    w2, b2 = lin(ks[2], ks[3], 64, 64)
    w3, b3 = lin(ks[4], ks[5], 64, n_elements)
    return w1, b1, w2, b2, w3, b3


def reference_forward(z, w1, b1, w2, b2, w3, b3):
    h = jnp.maximum(z @ w1 + b1, 0.0)
    h = h @ w2 + b2
    h = h @ w3 + b3
    return jax.nn.sigmoid(h)


if __name__ == "__main__":
    # --- primary test: the module's demo shapes (small) ---
    latent_dim = 32
    n_elements = 16
    batch = 8

    key = jax.random.PRNGKey(0)
    kz, kp = jax.random.split(key)
    z = jax.random.normal(kz, (batch, latent_dim), dtype=jnp.float32)
    params = init_params(kp, latent_dim, n_elements)

    out = jax.block_until_ready(generator_forward(z, *params))
    ref = reference_forward(z, *params)
    assert out.shape == (batch, n_elements)
    assert jnp.allclose(out, ref, atol=1e-5, rtol=1e-5)

    # --- secondary test: ragged batch + non-multiple-of-128 output exercises the adaptive
    #     batch grid (2 tiles), weight pinning, and the lane-padding/slicing path ---
    kz2, kp2 = jax.random.split(jax.random.PRNGKey(1))
    z2 = jax.random.normal(kz2, (300, latent_dim), dtype=jnp.float32)
    params2 = init_params(kp2, latent_dim, 200)
    out2 = jax.block_until_ready(generator_forward(z2, *params2))
    ref2 = reference_forward(z2, *params2)
    assert out2.shape == (300, 200)
    assert jnp.allclose(out2, ref2, atol=1e-5, rtol=1e-5)

    print("KERNEL_OK")
</pallas_src>

<mosaic_0001>
module attributes {stable_mosaic.version = 11 : i64} {
  func.func @generator_kernel(%arg0: i32, %arg1: memref<8x32xf32, #tpu.memory_space<vmem>>, %arg2: memref<32x64xf32, #tpu.memory_space<vmem>>, %arg3: memref<1x64xf32, #tpu.memory_space<vmem>>, %arg4: memref<64x128xf32, #tpu.memory_space<vmem>>, %arg5: memref<1x128xf32, #tpu.memory_space<vmem>>, %arg6: memref<8x128xf32, #tpu.memory_space<vmem>>) attributes {dimension_semantics = [#tpu.dimension_semantics<parallel>], iteration_bounds = array<i64: 1>, scalar_prefetch = 0 : i64, scratch_operands = 0 : i64, tpu.core_type = #tpu.core_type<tc>, window_params = [{transform_indices = @transform_0, window_bounds = array<i64: 8, 32>}, {pipeline_mode = #tpu.pipeline_mode<synchronous>, transform_indices = @transform_1, window_bounds = array<i64: 32, 64>}, {pipeline_mode = #tpu.pipeline_mode<synchronous>, transform_indices = @transform_2, window_bounds = array<i64: 1, 64>}, {pipeline_mode = #tpu.pipeline_mode<synchronous>, transform_indices = @transform_3, window_bounds = array<i64: 64, 128>}, {pipeline_mode = #tpu.pipeline_mode<synchronous>, transform_indices = @transform_4, window_bounds = array<i64: 1, 128>}, {transform_indices = @transform_5, window_bounds = array<i64: 8, 128>}]} {
    %c0 = arith.constant 0 : index
    %c0_0 = arith.constant 0 : index
    %0 = vector.load %arg1[%c0, %c0_0] : memref<8x32xf32, #tpu.memory_space<vmem>>, vector<8x32xf32>
    %c0_1 = arith.constant 0 : index
    %c0_2 = arith.constant 0 : index
    %1 = vector.load %arg2[%c0_1, %c0_2] : memref<32x64xf32, #tpu.memory_space<vmem>>, vector<32x64xf32>
    %cst = arith.constant dense<0.000000e+00> : vector<8x64xf32>
    %2 = tpu.matmul %0, %1, %cst {dimension_numbers = #tpu.dot_dimension_numbers<[1], [0], [0], [1], [0, 0, 1, 1], [], []>} : vector<8x32xf32>, vector<32x64xf32>, vector<8x64xf32> -> vector<8x64xf32>
    %c0_3 = arith.constant 0 : index
    %c0_4 = arith.constant 0 : index
    %3 = vector.load %arg3[%c0_3, %c0_4] : memref<1x64xf32, #tpu.memory_space<vmem>>, vector<1x64xf32>
    %4 = vector.broadcast %3 : vector<1x64xf32> to vector<8x64xf32>
    %5 = arith.addf %2, %4 : vector<8x64xf32>
    %cst_5 = arith.constant 0.000000e+00 : f32
    %6 = vector.broadcast %cst_5 : f32 to vector<8x64xf32>
    %7 = arith.maximumf %5, %6 : vector<8x64xf32>
    %c0_6 = arith.constant 0 : index
    %c0_7 = arith.constant 0 : index
    %8 = vector.load %arg4[%c0_6, %c0_7] : memref<64x128xf32, #tpu.memory_space<vmem>>, vector<64x128xf32>
    %cst_8 = arith.constant dense<0.000000e+00> : vector<8x128xf32>
    %9 = tpu.matmul %7, %8, %cst_8 {dimension_numbers = #tpu.dot_dimension_numbers<[1], [0], [0], [1], [0, 0, 1, 1], [], []>} : vector<8x64xf32>, vector<64x128xf32>, vector<8x128xf32> -> vector<8x128xf32>
    %c0_9 = arith.constant 0 : index
    %c0_10 = arith.constant 0 : index
    %10 = vector.load %arg5[%c0_9, %c0_10] : memref<1x128xf32, #tpu.memory_space<vmem>>, vector<1x128xf32>
    %11 = vector.broadcast %10 : vector<1x128xf32> to vector<8x128xf32>
    %12 = arith.addf %9, %11 : vector<8x128xf32>
    %13 = arith.negf %12 : vector<8x128xf32>
    %14 = math.exp %13 : vector<8x128xf32>
    %cst_11 = arith.constant 1.000000e+00 : f32
    %15 = vector.broadcast %cst_11 : f32 to vector<8x128xf32>
    %16 = arith.addf %15, %14 : vector<8x128xf32>
    %17 = arith.divf %15, %16 : vector<8x128xf32>
    %c0_12 = arith.constant 0 : index
    %c0_13 = arith.constant 0 : index
    %18 = vector.load %arg6[%c0_12, %c0_13] : memref<8x128xf32, #tpu.memory_space<vmem>>, vector<8x128xf32>
    tpu.vector_store %arg6[%c0_12, %c0_13], %17 {strides = array<i32>} : memref<8x128xf32, #tpu.memory_space<vmem>>, vector<8x128xf32>,
    return
  }
  func.func @transform_0(%arg0: i32) -> (i32, i32) {
    %c0_i32 = arith.constant 0 : i32
    %c0_i32_0 = arith.constant 0 : i32
    return %arg0, %c0_i32 : i32, i32
  }
  func.func @transform_1(%arg0: i32) -> (i32, i32) {
    %c0_i32 = arith.constant 0 : i32
    %c0_i32_0 = arith.constant 0 : i32
    %c0_i32_1 = arith.constant 0 : i32
    return %c0_i32, %c0_i32_0 : i32, i32
  }
  func.func @transform_2(%arg0: i32) -> (i32, i32) {
    %c0_i32 = arith.constant 0 : i32
    %c0_i32_0 = arith.constant 0 : i32
    %c0_i32_1 = arith.constant 0 : i32
    return %c0_i32, %c0_i32_0 : i32, i32
  }
  func.func @transform_3(%arg0: i32) -> (i32, i32) {
    %c0_i32 = arith.constant 0 : i32
    %c0_i32_0 = arith.constant 0 : i32
    %c0_i32_1 = arith.constant 0 : i32
    return %c0_i32, %c0_i32_0 : i32, i32
  }
  func.func @transform_4(%arg0: i32) -> (i32, i32) {
    %c0_i32 = arith.constant 0 : i32
    %c0_i32_0 = arith.constant 0 : i32
    %c0_i32_1 = arith.constant 0 : i32
    return %c0_i32, %c0_i32_0 : i32, i32
  }
  func.func @transform_5(%arg0: i32) -> (i32, i32) {
    %c0_i32 = arith.constant 0 : i32
    %c0_i32_0 = arith.constant 0 : i32
    return %arg0, %c0_i32 : i32, i32
  }
}

</mosaic_0001>

<bundles_post_ra>
// kernel: tpu_custom_call.1
= control target key start
LH: loop header
LB: loop body
LE: loop exit
PB: predicated region body
PF: predicated region fallthrough
CT: control target
= control target key end

     0   :  { %10 = vsyncpa [#allocation3], 0  ;;  %s532_s0 = inlined_call_operand.hbm [shape: f32[8,32], index: 0, kind: input, shape index: {}]   ;;  %s533_s1 = inlined_call_operand.hbm [shape: f32[32,64], index: 1, kind: input, shape index: {}]   ;;  %s534_s2 = inlined_call_operand.vmem [shape: f32[1,64], index: 2, kind: input, shape index: {}]   ;;  %s535_s3 = inlined_call_operand.hbm [shape: f32[64,128], index: 3, kind: input, shape index: {}]   ;;  %s536_s4 = inlined_call_operand.vmem [shape: f32[1,128], index: 4, kind: input, shape index: {}]   ;;  %s537_s5 = inlined_call_operand.hbm [shape: f32[8,128], index: 5, kind: output, shape index: {}]  }
   0x1   :  { %11 = vsyncpa [#allocation6], 0 }
   0x2   :  { %12 = vsyncpa [#allocation4], 0  ;;  %s433_s18 = smov [#allocation5]   ;;  %s339_s22 = scalar_lea.hbm %s533_s1, 512 }
   0x3   :  { %s28_s19 = sshll.u32 %s433_s18, 4  ;;  %p340_p0 = scmp.ne.s32.totalorder %s533_s1, %s339_s22  ;;  %s29_s19 = int_to_ptr.vmem [resolvable:$true] %s28_s19 }
   0x4   :  { %p343_p1 = scmp.lt.u32.totalorder %s339_s22, %s533_s1 }
   0x6   :  { %p345_p2 = pnand %p343_p1, %p340_p0 }
   0x8   :  { %348 = shalt.err (!%p345_p2)
}
   0x9   :  { %s349_s27 = scalar_lea.vmem %s29_s19, 512  ;;  %p354_p4 = scmp.lt.s32.totalorder %s29_s19, %s29_s19 }
   0xa   :  { %p350_p3 = scmp.ne.s32.totalorder %s29_s19, %s349_s27  ;;  %p355_p5 = scmp.lt.s32.totalorder %s349_s27, %s349_s27 }
   0xc   :  { %p356_p6 = por %p355_p5, %p354_p4 }
   0xe   :  { %p357_p7 = pnand %p356_p6, %p350_p3 }
  0x10   :  { %360 = shalt.err (!%p357_p7)
}
  0x11   :  { %s434_s28 = smov 128   ;;  %s435_s29 = smov 8  }
  0x12   :  { %34 = dma.hbm_to_vmem [thread:$0]  %s533_s1, 512, %s29_s19, [#allocation6], %s434_s28, %s434_s28, %s435_s29  }
  0x13   :  { %s436_s7 = smov [#allocation2]   ;;  %s437_s9 = smov [#allocation7]  }
  0x14   :  { %s19_s8 = sshll.u32 %s436_s7, 4  ;;  %s42_s10 = sshll.u32 %s437_s9, 4  ;;  %s20_s8 = int_to_ptr.vmem [resolvable:$true] %s19_s8  ;;  %s43_s10 = int_to_ptr.vmem [resolvable:$true] %s42_s10 }
  0x15   :  { %s361_s13 = scalar_lea.hbm %s532_s0, 128 }
  0x16   :  { %p362_p8 = scmp.ne.s32.totalorder %s532_s0, %s361_s13  ;;  %p365_p9 = scmp.lt.u32.totalorder %s361_s13, %s532_s0 }
  0x18   :  { %p367_p10 = pnand %p365_p9, %p362_p8 }
  0x1a   :  { %370 = shalt.err (!%p367_p10)
}
  0x1b   :  { %s371_s1 = scalar_lea.vmem %s20_s8, 128  ;;  %p376_p12 = scmp.lt.s32.totalorder %s20_s8, %s20_s8 }
  0x1c   :  { %p372_p11 = scmp.ne.s32.totalorder %s20_s8, %s371_s1  ;;  %p377_p13 = scmp.lt.s32.totalorder %s371_s1, %s371_s1 }
  0x1e   :  { %p378_p0 = por %p377_p13, %p376_p12 }
  0x20   :  { %p379_p1 = pnand %p378_p0, %p372_p11 }
  0x22   :  { %382 = shalt.err (!%p379_p1)
}
  0x23   :  { %22 = dma.hbm_to_vmem [thread:$0]  %s532_s0, 128, %s20_s8, [#allocation3]  }
  0x24   :  { %s383_s22 = scalar_lea.hbm %s535_s3, 1024 }
  0x25   :  { %p384_p2 = scmp.ne.s32.totalorder %s535_s3, %s383_s22  ;;  %p387_p3 = scmp.lt.u32.totalorder %s383_s22, %s535_s3 }
  0x27   :  { %p389_p4 = pnand %p387_p3, %p384_p2 }
  0x29   :  { %392 = shalt.err (!%p389_p4)
}
  0x2a   :  { %s393_s27 = scalar_lea.vmem %s43_s10, 1024  ;;  %p398_p6 = scmp.lt.s32.totalorder %s43_s10, %s43_s10 }
  0x2b   :  { %p394_p5 = scmp.ne.s32.totalorder %s43_s10, %s393_s27  ;;  %p399_p7 = scmp.lt.s32.totalorder %s393_s27, %s393_s27 }
  0x2d   :  { %p400_p8 = por %p399_p7, %p398_p6 }
  0x2f   :  { %p401_p9 = pnand %p400_p8, %p394_p5 }
  0x31   :  { %404 = shalt.err (!%p401_p9)
}
  0x32   :  { %48 = dma.hbm_to_vmem [thread:$0]  %s535_s3, 1024, %s43_s10, [#allocation6], %s434_s28, %s434_s28, %s435_s29  }
  0x33   :  { %427 = dma.done.wait [#allocation3], 128  }
  0x34   :  { %428 = vsyncadd [#allocation3], 4294967168 }
  0x35   :  { %429 = dma.done.wait [#allocation6], 1536  }
  0x36   :  { %430 = vsyncadd [#allocation6], 4294965760  ;;  %v438_v0 = vmov 0.0|0.0   ;;  %vm439_vm0 = vmmov 0   ;;  %v440_v1 = vmov 0.0   ;;  %v61_v2 = vld [vmem:[#allocation5] sm:$0xff] }
  0x37   :  { %308 = vmatprep.subr.bf16.mxu0 %v438_v0  ;;  %286 = vmatprep.mubr.msk.f32.mxu0 %vm439_vm0, %v440_v1  ;;  %v62_v3 = vld [vmem:[#allocation5 + $0x8] sm:$0xff]  ;;  %v63_v4 = vld [vmem:[#allocation5 + $0x10] sm:$0xff]  ;;  %v64_v6 = vld [vmem:[#allocation5 + $0x18] sm:$0xff]  ;;  %vm72_vm1 = vcmask 261120   ;;  %vm162_vm2 = vcmask 523264   ;;  %s441_s7 = smov [#allocation8]  }
  0x38   :  { %314 = vmatprep.subr.bf16.mxu1 %v438_v0  ;;  %305 = vmatprep.mubr.msk.f32.mxu1 %vm439_vm0, %v440_v1  ;;  %v309_v5 = vpack.c.bf16 %v62_v3, %v61_v2  ;;  %v147_v7 = vld [vmem:[#allocation7] sm:$0xff]  ;;  %v148_v8 = vld [vmem:[#allocation7 + $0x8] sm:$0xff]  ;;  %v149_v9 = vld [vmem:[#allocation7 + $0x10] sm:$0xff]  ;;  %v312_v11 = vpack.c.bf16 %v64_v6, %v63_v4 }
  0x39   :  { %v150_v10 = vld [vmem:[#allocation7 + $0x18] sm:$0xff]  ;;  %v315_v12 = vpack.c.bf16 %v148_v8, %v147_v7  ;;  %v151_v14 = vld [vmem:[#allocation7 + $0x20] sm:$0xff]  ;;  %v152_v15 = vld [vmem:[#allocation7 + $0x28] sm:$0xff] }
  0x3a   :  { %310 = vmatpush3.bf16.msra.mxu0 %v309_v5  ;;  %v318_v13 = vpack.c.bf16 %v150_v10, %v149_v9  ;;  %v60_v16 = vld [vmem:[#allocation2] sm:$0xff]  ;;  %v321_v17 = vpack.c.bf16 %v152_v15, %v151_v14  ;;  %v153_v18 = vld [vmem:[#allocation7 + $0x30] sm:$0xff] }
  0x3b   :  { %311 = vmatprep.subr.bf16.mxu0 %v438_v0  ;;  %316 = vmatpush3.bf16.msra.mxu1 %v315_v12  ;;  %v154_v19 = vld [vmem:[#allocation7 + $0x38] sm:$0xff] }
  0x3c   :  { %317 = vmatprep.subr.bf16.mxu1 %v438_v0  ;;  %v324_v20 = vpack.c.bf16 %v154_v19, %v153_v18  ;;  %v259_v21 = vld [vmem:[%s534_s2] ss:$0 sm:$0xff]  ;;  %s249_s2 = sshll.u32 %s441_s7, 4  ;;  %s250_s2 = int_to_ptr.vmem [resolvable:$true] %s249_s2 }
  0x3d   :  { %v261_v26 = vld [vmem:[%s536_s4] ss:$0 sm:$0xff]  ;;  %s405_s8 = scalar_lea.vmem %s250_s2, 128  ;;  %p410_p11 = scmp.lt.s32.totalorder %s250_s2, %s250_s2 }
  0x3e   :  { %313 = vmatpush3.bf16.msra.mxu0 %v312_v11  ;;  %p406_p10 = scmp.ne.s32.totalorder %s250_s2, %s405_s8  ;;  %p411_p12 = scmp.lt.s32.totalorder %s405_s8, %s405_s8 }
  0x3f   :  { %319 = vmatpush3.bf16.msra.mxu1 %v318_v13 }
  0x40   :  { %320 = vmatprep.subr.bf16.mxu1 %v438_v0  ;;  %p412_p13 = por %p411_p12, %p410_p11 }
  0x41   :  { %287 = vmatmul.mubr.msk.f32.vlgmr.msra.gmra.mrb[0].mxu0 %vm72_vm1, %v60_v16 }
  0x42   :  { %p413_p0 = pnand %p412_p13, %p406_p10 }
  0x43   :  { %322 = vmatpush3.bf16.msra.mxu1 %v321_v17 }
  0x44   :  { %323 = vmatprep.subr.bf16.mxu1 %v438_v0 }
  0x47   :  { %325 = vmatpush3.bf16.msra.mxu1 %v324_v20 }
 0x114   :  { %v142_v22 = vpop.f32.mrb[0].mxu0 }
 0x115   :  { %v143_v23 = vadd.f32 %v259_v21, %v142_v22  ;;  %v288_v24 = vpop.f32.mrb[1].mxu0 }
 0x117   :  { %v146_v25 = vmax.f32 %v143_v23, 0.0 }
 0x119   :  { %306 = vmatmul.mubr.msk.f32.vlgmr.msra.gmra.mrb[0].mxu1 %vm162_vm2, %v146_v25 }
 0x1ec   :  { %v232_v27 = vpop.f32.mrb[0].mxu1 }
 0x1ed   :  { %v233_v28 = vadd.f32 %v261_v26, %v232_v27  ;;  %v307_v29 = vpop.f32.mrb[1].mxu1 }
 0x1ef   :  { %v263_v30 = vmul.f32 -1.442695, %v233_v28 }
 0x1f1   :  { %335 = vpow2.f32 %v263_v30 }
 0x1fb   :  { %v336_v31 = vpop.eup %335 }
 0x1fc   :  { %v239_v32 = vadd.f32 1.0, %v336_v31 }
 0x1fe   :  { %337 = vrcp.f32 %v239_v32 }
 0x208   :  { %v338_v33 = vpop.eup %337 }
 0x209   :  { %242 = vst [vmem:[#allocation8] sm:$0xff] %v338_v33 }
 0x20a   :  { %416 = shalt.err (!%p413_p0)
}
 0x20b   :  { %s417_s10 = scalar_lea.hbm %s537_s5, 128 }
 0x20c   :  { %p418_p1 = scmp.ne.s32.totalorder %s537_s5, %s417_s10  ;;  %p421_p2 = scmp.lt.u32.totalorder %s417_s10, %s537_s5 }
 0x20e   :  { %p423_p3 = pnand %p421_p2, %p418_p1 }
 0x210   :  { %426 = shalt.err (!%p423_p3)
}
 0x211   :  { %252 = dma.vmem_to_hbm [thread:$0]  %s250_s2, 128, %s537_s5, [#allocation4]  }
 0x212   :  { %431 = dma.done.wait [#allocation4], 128  }
 0x213   :  { %432 = vsyncadd [#allocation4], 4294967168 }
 0x214   :  { %256 = vsyncpa [#allocation3], 1 }
 0x215   :  { %257 = vsyncpa [#allocation6], 1 }
 0x216   :  { %258 = vsyncpa [#allocation4], 1 }

</bundles_post_ra>
